<compile_context>
chip_gen: v5e
topology: v5e:2x2
jax: 0.10.0
libtpu: 0.0.40
codegen_flags: <defaults>
</compile_context>

<pallas_src>
import jax
import jax.numpy as jnp
from jax.experimental import pallas as pl
from jax.experimental.pallas import tpu as pltpu

EPS = 1e-08


def _round_up(x, m):
    return (x + m - 1) // m * m


def _cdiv(a, b):
    return -(-a // b)


def _col_chunk(n):
    """Output-column chunk width for the in-kernel epilogue loop."""
    for c in (512, 256, 128):
        if n > c and n % c == 0:
            return c
    return n


def _choose_row_tiling(M, L, N, vmem_budget_bytes=20 * 1024 * 1024):
    """Pick (tile_m, num_tiles, m_pad).

    Prefers: no row padding (tile equals full M, or tile divides M),
    >= 4 grid steps when there is enough data (megacore + pipelining),
    per-step working set under `vmem_budget_bytes`.
    """
    # Rough double-buffered per-row footprint: x (f32, 2 bufs) + out (f32,
    # 2 bufs) + one chunk of u/v intermediates (bounded by N).
    per_row = 8 * L + 8 * N + 8 * min(N, 512)
    max_tile = max(128, min(1024, (vmem_budget_bytes // per_row) // 128 * 128))

    if M % 128 != 0 and M <= max_tile:
        # Single full-M block: block_shape == full array dims, so the (8,128)
        # divisibility rule does not apply and no padding/slicing is needed.
        return M, 1, M

    if M % 128 == 0:
        units = M // 128
        min_steps = min(4, units)
        best = 1
        for tu in range(1, units + 1):
            if units % tu != 0 or tu * 128 > max_tile:
                continue
            if units // tu < min_steps:
                continue
            best = tu
        tile_m = best * 128
        return tile_m, units // best, M

    # Ragged, large M: pad rows up to the tile grid (padded rows give zero
    # output and are sliced away in the wrapper).
    m_pad = _round_up(M, 128)
    units = m_pad // 128
    min_steps = min(4, units)
    num_tiles = max(min_steps, _cdiv(m_pad, max_tile))
    tile_m = _round_up(_cdiv(m_pad, num_tiles), 128)
    num_tiles = _cdiv(m_pad, tile_m)
    m_pad = num_tiles * tile_m
    return tile_m, num_tiles, m_pad


def _encoder_kernel(x_ref, wu_ref, wv_ref, out_ref, norm_ref):
    # x_ref:    (TM, L)  raw mixture rows, f32
    # wu_ref:   (L, N)   U weight (transposed Conv1d weight), bf16
    # wv_ref:   (L, N)   V weight (transposed Conv1d weight), bf16
    # out_ref:  (TM, N)  relu(U xn) * sigmoid(V xn), f32
    # norm_ref: (TM, 1)  per-row L2 norm, f32
    x = x_ref[...]

    # Single row-sum reduction; norm column is stored directly (no relayout).
    s = jnp.sum(x * x, axis=-1, keepdims=True)          # (TM, 1)
    norm = jnp.sqrt(s)                                   # (TM, 1)
    norm_ref[...] = norm

    # Normalize in f32, cast to bf16 only for the MXU operands.
    xn = (x / (norm + EPS)).astype(wu_ref.dtype)         # (TM, L) bf16

    n = out_ref.shape[-1]
    chunk = _col_chunk(n)
    # Static (unrolled) loop over output-column chunks: each chunk is
    # matmul -> relu/sigmoid/mul -> store, so the gated product never lives as
    # a full (TM, 2*N) f32 intermediate in VMEM.
    for c0 in range(0, n, chunk):
        u = jnp.dot(xn, wu_ref[:, c0:c0 + chunk],
                    preferred_element_type=jnp.float32)  # (TM, chunk) f32
        v = jnp.dot(xn, wv_ref[:, c0:c0 + chunk],
                    preferred_element_type=jnp.float32)  # (TM, chunk) f32
        conv = jnp.maximum(u, 0.0)                        # ReLU (VPU)
        gate = 0.5 * jnp.tanh(0.5 * v) + 0.5              # sigmoid, 1 EUP op
        out_ref[:, c0:c0 + chunk] = (conv * gate).astype(out_ref.dtype)


def encoder_forward(mixture, w_u, w_v):
    """mixture: [B, K, L]; w_u, w_v: [N, L] (PyTorch Conv1d weight squeezed).

    Returns (mixture_w [B, K, N], norm_coef [B, K, 1]).
    """
    B, K, L = mixture.shape
    N = w_u.shape[0]
    M = B * K

    tile_m, num_tiles, m_pad = _choose_row_tiling(M, L, N)

    x = mixture.reshape(M, L)                  # f32 (no wrapper dtype cast)
    if m_pad != M:
        x = jnp.pad(x, ((0, m_pad - M), (0, 0)))   # zero rows -> zero output

    # bf16 weights for the MXU; columns stay exactly N (no padding) so the
    # kernel output is returned as a free view, not an XLA slice-copy.
    wu_t = jnp.transpose(w_u).astype(jnp.bfloat16)   # (L, N)
    wv_t = jnp.transpose(w_v).astype(jnp.bfloat16)   # (L, N)

    out, norm = pl.pallas_call(
        _encoder_kernel,
        out_shape=(
            jax.ShapeDtypeStruct((m_pad, N), jnp.float32),
            jax.ShapeDtypeStruct((m_pad, 1), jnp.float32),
        ),
        grid_spec=pltpu.PrefetchScalarGridSpec(
            num_scalar_prefetch=0,
            grid=(num_tiles,),
            in_specs=[
                pl.BlockSpec((tile_m, L), lambda i: (i, 0)),
                # Weight blocks are grid-constant (index (0,0)); the pipeline
                # does not re-fetch them per step.
                pl.BlockSpec((L, N), lambda i: (0, 0)),
                pl.BlockSpec((L, N), lambda i: (0, 0)),
            ],
            out_specs=[
                pl.BlockSpec((tile_m, N), lambda i: (i, 0)),
                pl.BlockSpec((tile_m, 1), lambda i: (i, 0)),
            ],
        ),
        compiler_params=pltpu.CompilerParams(
            dimension_semantics=("parallel",),
            vmem_limit_bytes=32 * 1024 * 1024,
        ),
    )(x, wu_t, wv_t)

    if m_pad != M:
        out = out[:M]
        norm = norm[:M]
    mixture_w = out.reshape(B, K, N)
    norm_coef = norm.reshape(B, K, 1)
    return mixture_w, norm_coef


def encoder_reference(mixture, w_u, w_v):
    """Pure-JAX reference mirroring the PyTorch forward exactly (f32)."""
    B, K, L = mixture.shape
    N = w_u.shape[0]
    norm_coef = jnp.sqrt(jnp.sum(mixture * mixture, axis=2, keepdims=True))
    norm_mixture = mixture / (norm_coef + EPS)                  # [B,K,L]
    xrow = norm_mixture.reshape(-1, L)                          # [B*K, L]
    conv = jax.nn.relu(xrow @ w_u.T)                            # [B*K, N]
    gate = jax.nn.sigmoid(xrow @ w_v.T)                         # [B*K, N]
    mixture_w = (conv * gate).reshape(B, K, N)
    return mixture_w, norm_coef


if __name__ == "__main__":
    # Small shapes consistent with the module: B=2, K=8 segments, L=16, N=32.
    B, K, L, N = 2, 8, 16, 32

    key = jax.random.PRNGKey(0)
    k1, k2, k3 = jax.random.split(key, 3)

    mixture = jax.random.normal(k1, (B, K, L), dtype=jnp.float32)
    # Conv1d(L, N, kernel_size=1, bias=False) weight is (N, L, 1); keep the
    # squeezed (N, L) matrix, deterministically initialized.
    w_u = jax.random.normal(k2, (N, L), dtype=jnp.float32) * 0.1
    w_v = jax.random.normal(k3, (N, L), dtype=jnp.float32) * 0.1

    fwd = jax.jit(encoder_forward)
    mixture_w, norm_coef = fwd(mixture, w_u, w_v)
    mixture_w = jax.block_until_ready(mixture_w)
    norm_coef = jax.block_until_ready(norm_coef)

    ref_w, ref_norm = encoder_reference(mixture, w_u, w_v)

    assert mixture_w.shape == (B, K, N)
    assert norm_coef.shape == (B, K, 1)
    # norm_coef is computed in f32 exactly; mixture_w tolerance covers the
    # bf16 MXU operands (accumulation stays f32).
    assert jnp.allclose(norm_coef, ref_norm, atol=1e-5, rtol=1e-5)
    assert jnp.allclose(mixture_w, ref_w, atol=1e-2, rtol=1e-2)

    print("KERNEL_OK")
</pallas_src>

<mosaic_0001>
module attributes {stable_mosaic.version = 11 : i64} {
  func.func @_encoder_kernel(%arg0: i32, %arg1: memref<16x16xf32, #tpu.memory_space<vmem>>, %arg2: memref<16x32xbf16, #tpu.memory_space<vmem>>, %arg3: memref<16x32xbf16, #tpu.memory_space<vmem>>, %arg4: memref<16x32xf32, #tpu.memory_space<vmem>>, %arg5: memref<16x1xf32, #tpu.memory_space<vmem>>) attributes {dimension_semantics = [#tpu.dimension_semantics<parallel>], iteration_bounds = array<i64: 1>, scalar_prefetch = 0 : i64, scratch_operands = 0 : i64, tpu.core_type = #tpu.core_type<tc>, window_params = [{transform_indices = @transform_0, window_bounds = array<i64: 16, 16>}, {pipeline_mode = #tpu.pipeline_mode<synchronous>, transform_indices = @transform_1, window_bounds = array<i64: 16, 32>}, {pipeline_mode = #tpu.pipeline_mode<synchronous>, transform_indices = @transform_2, window_bounds = array<i64: 16, 32>}, {transform_indices = @transform_3, window_bounds = array<i64: 16, 32>}, {transform_indices = @transform_4, window_bounds = array<i64: 16, 1>}]} {
    %c0 = arith.constant 0 : index
    %c0_0 = arith.constant 0 : index
    %0 = vector.load %arg1[%c0, %c0_0] : memref<16x16xf32, #tpu.memory_space<vmem>>, vector<16x16xf32>
    %1 = arith.mulf %0, %0 : vector<16x16xf32>
    %cst = arith.constant dense<0.000000e+00> : vector<16xf32>
    %2 = vector.multi_reduction <add>, %1, %cst [1] : vector<16x16xf32> to vector<16xf32>
    %3 = vector.shape_cast %2 : vector<16xf32> to vector<16x1xf32>
    %4 = math.sqrt %3 : vector<16x1xf32>
    %c0_1 = arith.constant 0 : index
    %c0_2 = arith.constant 0 : index
    %5 = vector.load %arg5[%c0_1, %c0_2] : memref<16x1xf32, #tpu.memory_space<vmem>>, vector<16x1xf32>
    tpu.vector_store %arg5[%c0_1, %c0_2], %4 {strides = array<i32>} : memref<16x1xf32, #tpu.memory_space<vmem>>, vector<16x1xf32>,
    %cst_3 = arith.constant 9.99999993E-9 : f32
    %6 = vector.broadcast %cst_3 : f32 to vector<16x1xf32>
    %7 = arith.addf %4, %6 : vector<16x1xf32>
    %8 = vector.broadcast %7 : vector<16x1xf32> to vector<16x16xf32>
    %9 = arith.divf %0, %8 : vector<16x16xf32>
    %10 = arith.truncf %9 : vector<16x16xf32> to vector<16x16xbf16>
    %c0_4 = arith.constant 0 : index
    %c0_5 = arith.constant 0 : index
    %11 = vector.load %arg2[%c0_4, %c0_5] : memref<16x32xbf16, #tpu.memory_space<vmem>>, vector<16x32xbf16>
    %cst_6 = arith.constant dense<0.000000e+00> : vector<16x32xf32>
    %12 = tpu.matmul %10, %11, %cst_6 {dimension_numbers = #tpu.dot_dimension_numbers<[1], [0], [0], [1], [0, 0, 1, 1], [], []>} : vector<16x16xbf16>, vector<16x32xbf16>, vector<16x32xf32> -> vector<16x32xf32>
    %c0_7 = arith.constant 0 : index
    %c0_8 = arith.constant 0 : index
    %13 = vector.load %arg3[%c0_7, %c0_8] : memref<16x32xbf16, #tpu.memory_space<vmem>>, vector<16x32xbf16>
    %cst_9 = arith.constant dense<0.000000e+00> : vector<16x32xf32>
    %14 = tpu.matmul %10, %13, %cst_9 {dimension_numbers = #tpu.dot_dimension_numbers<[1], [0], [0], [1], [0, 0, 1, 1], [], []>} : vector<16x16xbf16>, vector<16x32xbf16>, vector<16x32xf32> -> vector<16x32xf32>
    %cst_10 = arith.constant 0.000000e+00 : f32
    %15 = vector.broadcast %cst_10 : f32 to vector<16x32xf32>
    %16 = arith.maximumf %12, %15 : vector<16x32xf32>
    %cst_11 = arith.constant 5.000000e-01 : f32
    %17 = vector.broadcast %cst_11 : f32 to vector<16x32xf32>
    %18 = arith.mulf %17, %14 : vector<16x32xf32>
    %19 = math.tanh %18 : vector<16x32xf32>
    %cst_12 = arith.constant 5.000000e-01 : f32
    %20 = vector.broadcast %cst_12 : f32 to vector<16x32xf32>
    %21 = arith.mulf %20, %19 : vector<16x32xf32>
    %cst_13 = arith.constant 5.000000e-01 : f32
    %22 = vector.broadcast %cst_13 : f32 to vector<16x32xf32>
    %23 = arith.addf %21, %22 : vector<16x32xf32>
    %24 = arith.mulf %16, %23 : vector<16x32xf32>
    %c0_14 = arith.constant 0 : index
    %c0_15 = arith.constant 0 : index
    %25 = vector.load %arg4[%c0_14, %c0_15] : memref<16x32xf32, #tpu.memory_space<vmem>>, vector<16x32xf32>
    tpu.vector_store %arg4[%c0_14, %c0_15], %24 {strides = array<i32>} : memref<16x32xf32, #tpu.memory_space<vmem>>, vector<16x32xf32>,
    return
  }
  func.func @transform_0(%arg0: i32) -> (i32, i32) {
    %c0_i32 = arith.constant 0 : i32
    %c0_i32_0 = arith.constant 0 : i32
    return %arg0, %c0_i32 : i32, i32
  }
  func.func @transform_1(%arg0: i32) -> (i32, i32) {
    %c0_i32 = arith.constant 0 : i32
    %c0_i32_0 = arith.constant 0 : i32
    %c0_i32_1 = arith.constant 0 : i32
    return %c0_i32, %c0_i32_0 : i32, i32
  }
  func.func @transform_2(%arg0: i32) -> (i32, i32) {
    %c0_i32 = arith.constant 0 : i32
    %c0_i32_0 = arith.constant 0 : i32
    %c0_i32_1 = arith.constant 0 : i32
    return %c0_i32, %c0_i32_0 : i32, i32
  }
  func.func @transform_3(%arg0: i32) -> (i32, i32) {
    %c0_i32 = arith.constant 0 : i32
    %c0_i32_0 = arith.constant 0 : i32
    return %arg0, %c0_i32 : i32, i32
  }
  func.func @transform_4(%arg0: i32) -> (i32, i32) {
    %c0_i32 = arith.constant 0 : i32
    %c0_i32_0 = arith.constant 0 : i32
    return %arg0, %c0_i32 : i32, i32
  }
}

</mosaic_0001>

<bundles_post_ra>
// kernel: encoder_forward.1
= control target key start
LH: loop header
LB: loop body
LE: loop exit
PB: predicated region body
PF: predicated region fallthrough
CT: control target
= control target key end

     0   :  { %vm22_vm0 = vcmask 130048   ;;  %s291_s0 = inlined_call_operand.vmem [shape: f32[16,16], index: 0, kind: input, shape index: {}]   ;;  %s292_s1 = inlined_call_operand.vmem [shape: bf16[16,32], index: 1, kind: input, shape index: {}]   ;;  %s293_s2 = inlined_call_operand.vmem [shape: bf16[16,32], index: 2, kind: input, shape index: {}]   ;;  %s294_s3 = inlined_call_operand.hbm [shape: f32[16,32], index: 3, kind: output, shape index: {0}]   ;;  %s295_s4 = inlined_call_operand.vmem [shape: f32[16,1], index: 4, kind: output, shape index: {1}]  }
   0x1   :  { %v257_v0 = vld [vmem:[%s291_s0] sm:$0xff] }
   0x2   :  { %10 = vsyncpa [#allocation3], 0  ;;  %v20_v1 = vmul.f32 %v257_v0, %v257_v0  ;;  %v264_v2 = vld [vmem:[%s291_s0 + $0x8] sm:$0xff]  ;;  %v183_v7 = vld [vmem:[%s292_s1] sm:$0xff]  ;;  %vm53_vm2 = vcmask 7168   ;;  %vm148_vm14 = vcmask 261120  }
   0x3   :  { %v21_v4 = vmul.f32 %v264_v2, %v264_v2  ;;  %v184_v8 = vld [vmem:[%s293_s2] sm:$0xff]  ;;  %107 = vmatpush.bf16.msra.mxu0 %v183_v7  ;;  %s157_s27 = sshll.u32 %s294_s3, 4  ;;  %s227_s28 = smov 128   ;;  %s158_s27 = int_to_ptr.hbm [resolvable:$true] %s157_s27 }
   0x4   :  { %v23_v3 = vsel %vm22_vm0, %v20_v1, 0.0  ;;  %129 = vmatpush.bf16.msra.mxu1 %v184_v8  ;;  %s228_s29 = smov 8  }
   0x5   :  { %24 = vadd.xlane.f32.xlu0 %v23_v3  ;;  %v26_v5 = vsel %vm22_vm0, %v21_v4, 0.0 }
   0xd   :  { %27 = vadd.xlane.f32.xlu0 %v26_v5 }
  0x78   :  { %v25_v6 = vpop.xlane.xlu0 %24 }
  0x79   :  { %188 = vrsqrt.f32 %v25_v6  ;;  %vm36_vm1 = vcmp.eq.f32.partialorder %v25_v6, inf  ;;  %v39_v20 = vand.u32 2147483648, %v25_v6  ;;  %vm38_vm3 = vcmp.eq.f32.partialorder %v25_v6, 0.0 }
  0x7f   :  { %v189_v9 = vpop.eup %188 }
  0x80   :  { %v30_v10 = vmul.f32 %v189_v9, %v25_v6  ;;  %v28_v11 = vpop.xlane.xlu0 %27 }
  0x81   :  { %190 = vrsqrt.f32 %v28_v11  ;;  %vm48_vm4 = vcmp.eq.f32.partialorder %v28_v11, inf  ;;  %v51_v28 = vand.u32 2147483648, %v28_v11  ;;  %vm50_vm5 = vcmp.eq.f32.partialorder %v28_v11, 0.0 }
  0x82   :  { %v31_v12 = vmul.f32 %v189_v9, %v30_v10 }
  0x84   :  { %v32_v13 = vmul.f32 0.5, %v31_v12 }
  0x86   :  { %v33_v14 = vsub.f32 1.5, %v32_v13 }
  0x87   :  { %v191_v15 = vpop.eup %190 }
  0x88   :  { %v34_v16 = vmul.f32 %v189_v9, %v33_v14  ;;  %v42_v17 = vmul.f32 %v191_v15, %v28_v11 }
  0x8a   :  { %v35_v18 = vmul.f32 %v34_v16, %v25_v6  ;;  %v43_v19 = vmul.f32 %v191_v15, %v42_v17 }
  0x8c   :  { %v37_v21 = vsel %vm36_vm1, %v25_v6, %v35_v18  ;;  %v44_v22 = vmul.f32 0.5, %v43_v19 }
  0x8d   :  { %v40_v23 = vsel %vm38_vm3, %v39_v20, %v37_v21 }
  0x8e   :  { %v56_v24 = vadd.f32 1e-08, %v40_v23  ;;  %54 = vst.msk [vmem:[%s295_s4] sm:$0xff] %vm53_vm2, %v40_v23  ;;  %v45_v25 = vsub.f32 1.5, %v44_v22 }
  0x90   :  { %192 = vrcp.f32 %v56_v24  ;;  %v46_v26 = vmul.f32 %v191_v15, %v45_v25  ;;  %v69_v39 = vand.u32 2147483648, %v56_v24  ;;  %vm63_vm7 = vweird.f32 %v56_v24 }
  0x91   :  { %v67_v40 = vand.u32 2147483647, %v56_v24 }
  0x92   :  { %v47_v27 = vmul.f32 %v46_v26, %v28_v11  ;;  %v70_v46 = vor.u32 1.1754944e-38, %v69_v39 }
  0x93   :  { %vm68_vm10 = vcmp.eq.f32.partialorder %v67_v40, 8.507059e+37 }
  0x94   :  { %v49_v29 = vsel %vm48_vm4, %v28_v11, %v47_v27 }
  0x95   :  { %v52_v30 = vsel %vm50_vm5, %v51_v28, %v49_v29 }
  0x96   :  { %v193_v31 = vpop.eup %192  ;;  %55 = vst.msk [vmem:[%s295_s4 + $0x8] sm:$0xff] %vm53_vm2, %v52_v30  ;;  %v57_v32 = vadd.f32 1e-08, %v52_v30  ;;  %s226_s4 = smov [#allocation2]  }
  0x97   :  { %v59_v33 = vmul.f32 %v193_v31, %v56_v24  ;;  %vm64_vm6 = vweird.f32 %v193_v31  ;;  %s155_s24 = sshll.u32 %s226_s4, 4  ;;  %s156_s24 = int_to_ptr.vmem [resolvable:$true] %s155_s24 }
  0x98   :  { %194 = vrcp.f32 %v57_v32  ;;  %vm65_vm8 = vmor %vm63_vm7, %vm64_vm6  ;;  %v84_v42 = vand.u32 2147483648, %v57_v32  ;;  %v82_v45 = vand.u32 2147483647, %v57_v32  ;;  %vm78_vm11 = vweird.f32 %v57_v32 }
  0x99   :  { %v60_v34 = vsub.f32 1.0, %v59_v33 }
  0x9a   :  { %v85_v49 = vor.u32 1.1754944e-38, %v84_v42  ;;  %vm83_vm13 = vcmp.eq.f32.partialorder %v82_v45, 8.507059e+37 }
  0x9b   :  { %v61_v35 = vmul.f32 %v193_v31, %v60_v34 }
  0x9d   :  { %v62_v37 = vadd.f32 %v193_v31, %v61_v35 }
  0x9e   :  { %v195_v36 = vpop.eup %194 }
  0x9f   :  { %v74_v38 = vmul.f32 %v195_v36, %v57_v32  ;;  %v66_v43 = vsel %vm65_vm8, %v193_v31, %v62_v37  ;;  %vm79_vm9 = vweird.f32 %v195_v36 }
  0xa0   :  { %v71_v48 = vsel %vm68_vm10, %v70_v46, %v66_v43  ;;  %vm80_vm12 = vmor %vm78_vm11, %vm79_vm9 }
  0xa1   :  { %v75_v41 = vsub.f32 1.0, %v74_v38  ;;  %v72_v52 = vmul.f32 %v71_v48, %v257_v0 }
  0xa3   :  { %v76_v44 = vmul.f32 %v195_v36, %v75_v41 }
  0xa5   :  { %v77_v47 = vadd.f32 %v195_v36, %v76_v44 }
  0xa7   :  { %v81_v50 = vsel %vm80_vm12, %v195_v36, %v77_v47 }
  0xa8   :  { %v86_v51 = vsel %vm83_vm13, %v85_v49, %v81_v50 }
  0xa9   :  { %v87_v53 = vmul.f32 %v86_v51, %v264_v2 }
  0xab   :  { %v88_v54 = vpack.c.bf16 %v87_v53, %v72_v52 }
  0xad   :  { %177 = vmatmul.msk.bf16.vlgmr.msra.gmra.mxu0 %vm22_vm0, %v88_v54  ;;  %182 = vmatmul.msk.bf16.vlgmr.msra.gmra.mxu1 %vm22_vm0, %v88_v54 }
 0x12a   :  { %v131_v55 = vpop.f32.mrf.mxu1  ;;  %v109_v57 = vpop.f32.mrf.mxu0 }
 0x12b   :  { %v138_v56 = vmul.f32 0.5, %v131_v55  ;;  %v136_v62 = vmax.f32 %v109_v57, 0.0 }
 0x12d   :  { %196 = vtanh.f32 %v138_v56 }
 0x132   :  { %v133_v58 = vpop.f32.mrf.mxu1  ;;  %v111_v2 = vpop.f32.mrf.mxu0 }
 0x133   :  { %v197_v59 = vpop.eup %196  ;;  %v139_v60 = vmul.f32 0.5, %v133_v58  ;;  %v137_v4 = vmax.f32 %v111_v2, 0.0 }
 0x134   :  { %v142_v61 = vmul.f32 0.5, %v197_v59 }
 0x135   :  { %198 = vtanh.f32 %v139_v60 }
 0x136   :  { %v144_v63 = vadd.f32 0.5, %v142_v61 }
 0x138   :  { %v146_v0 = vmul.f32 %v144_v63, %v136_v62 }
 0x13a   :  { %149 = vst.msk [vmem:[#allocation2] sm:$0xff] %vm148_vm14, %v146_v0 }
 0x13b   :  { %v199_v1 = vpop.eup %198 }
 0x13c   :  { %v143_v3 = vmul.f32 0.5, %v199_v1 }
 0x13e   :  { %v145_v5 = vadd.f32 0.5, %v143_v3 }
 0x140   :  { %v147_v6 = vmul.f32 %v145_v5, %v137_v4 }
 0x142   :  { %150 = vst.msk [vmem:[#allocation2 + $0x8] sm:$0xff] %vm148_vm14, %v147_v6 }
 0x143   :  { %163 = dma.vmem_to_hbm [thread:$0]  %s156_s24, 256, %s158_s27, [#allocation3], %s227_s28, %s227_s28, %s228_s29  }
 0x144   :  { %224 = dma.done.wait [#allocation3], 256  }
 0x145   :  { %225 = vsyncadd [#allocation3], 4294967040 }
 0x146   :  { %172 = vsyncpa [#allocation3], 1 }

</bundles_post_ra>
